<compile_context>
chip_gen: v6e
topology: v6e:2x2x1
jax: 0.10.0
libtpu: 0.0.40
codegen_flags: <defaults>
</compile_context>

<pallas_src>
import jax
import jax.numpy as jnp
from jax.experimental import pallas as pl
from jax.experimental.pallas import tpu as pltpu

_LANE = 128


def _round_up(x, m):
    return ((x + m - 1) // m) * m


def _discriminator_kernel(x_ref, w1_ref, b1_ref, w2_ref, b2_ref, w3_ref, b3_ref,
                          o_ref):
    def sigmoid(h):
        # exp -> EUP, reciprocal(approx) -> EUP vrcp; keeps VALU free.
        return pl.reciprocal(1.0 + jnp.exp(-h), approx=True)

    # Layer 1: Linear + sigmoid
    h = jnp.dot(x_ref[...], w1_ref[...], preferred_element_type=jnp.float32)
    h = sigmoid(h + b1_ref[...])
    # Layer 2: Linear + sigmoid
    h = jnp.dot(h, w2_ref[...], preferred_element_type=jnp.float32)
    h = sigmoid(h + b2_ref[...])
    # Layer 3: Linear + sigmoid
    h = jnp.dot(h, w3_ref[...], preferred_element_type=jnp.float32)
    o_ref[...] = sigmoid(h + b3_ref[...]).astype(o_ref.dtype)


def discriminator_forward(x, params, *, batch_tile=128):
    """Run the full 3-layer MLP inside a single batch-tiled Pallas kernel.

    x:      [B, input_size] float32
    params: dict with w1t [in,h], b1 [1,h], w2t [h,h], b2 [1,h],
            w3t [h,out], b3 [1,out]   (all unpadded, W stored transposed)
    returns [B, output_size] float32
    """
    w1t, b1 = params["w1t"], params["b1"]
    w2t, b2 = params["w2t"], params["b2"]
    w3t, b3 = params["w3t"], params["b3"]

    batch, in_size = x.shape
    hidden = w1t.shape[1]
    out_size = w3t.shape[1]

    # Lane-pad feature dims to 128, batch-pad to a whole number of tiles.
    in_p = _round_up(in_size, _LANE)
    hid_p = _round_up(hidden, _LANE)
    out_p = _round_up(out_size, _LANE)
    tb = batch_tile                       # 128 works on v5e/v6e/v7x; use 256 on v6e/v7x for big batches
    b_p = _round_up(max(batch, tb), tb)

    f32 = jnp.float32
    xp = jnp.zeros((b_p, in_p), f32).at[:batch, :in_size].set(x.astype(f32))
    w1p = jnp.zeros((in_p, hid_p), f32).at[:in_size, :hidden].set(w1t)
    b1p = jnp.zeros((1, hid_p), f32).at[:, :hidden].set(b1)
    w2p = jnp.zeros((hid_p, hid_p), f32).at[:hidden, :hidden].set(w2t)
    b2p = jnp.zeros((1, hid_p), f32).at[:, :hidden].set(b2)
    w3p = jnp.zeros((hid_p, out_p), f32).at[:hidden, :out_size].set(w3t)
    b3p = jnp.zeros((1, out_p), f32).at[:, :out_size].set(b3)

    grid = (b_p // tb,)

    flops = 2 * b_p * (in_p * hid_p + hid_p * hid_p + hid_p * out_p)
    transcendentals = 2 * b_p * (2 * hid_p + out_p)   # exp + reciprocal per act
    bytes_accessed = 4 * (b_p * in_p + b_p * out_p
                          + in_p * hid_p + hid_p * hid_p + hid_p * out_p
                          + 2 * hid_p + out_p)

    out_padded = pl.pallas_call(
        _discriminator_kernel,
        out_shape=jax.ShapeDtypeStruct((b_p, out_p), jnp.float32),
        grid=grid,
        in_specs=[
            # activations: tiled over batch
            pl.BlockSpec((tb, in_p), lambda i: (i, 0)),
            # weights / biases: constant index_map -> VMEM-resident across steps
            pl.BlockSpec((in_p, hid_p), lambda i: (0, 0)),
            pl.BlockSpec((1, hid_p), lambda i: (0, 0)),
            pl.BlockSpec((hid_p, hid_p), lambda i: (0, 0)),
            pl.BlockSpec((1, hid_p), lambda i: (0, 0)),
            pl.BlockSpec((hid_p, out_p), lambda i: (0, 0)),
            pl.BlockSpec((1, out_p), lambda i: (0, 0)),
        ],
        out_specs=pl.BlockSpec((tb, out_p), lambda i: (i, 0)),
        compiler_params=pltpu.CompilerParams(
            dimension_semantics=("parallel",)),
        cost_estimate=pl.CostEstimate(
            flops=flops,
            transcendentals=transcendentals,
            bytes_accessed=bytes_accessed),
    )(xp, w1p, b1p, w2p, b2p, w3p, b3p)

    # Strip batch and output-lane padding.
    return out_padded[:batch, :out_size]


def init_params(key, input_size, hidden_size, output_size):
    """Deterministic synthetic parameter init (matches nn.Linear shapes,
    stored transposed for the kernel)."""
    ks = jax.random.split(key, 6)

    def linear(kw, kb, fan_in, fan_out):
        bound = 1.0 / jnp.sqrt(jnp.float32(fan_in))
        # torch stores W as [out, in]; we keep W^T = [in, out]
        wt = jax.random.uniform(kw, (fan_in, fan_out), jnp.float32, -bound, bound)
        b = jax.random.uniform(kb, (1, fan_out), jnp.float32, -bound, bound)
        return wt, b

    w1t, b1 = linear(ks[0], ks[1], input_size, hidden_size)
    w2t, b2 = linear(ks[2], ks[3], hidden_size, hidden_size)
    w3t, b3 = linear(ks[4], ks[5], hidden_size, output_size)
    return dict(w1t=w1t, b1=b1, w2t=w2t, b2=b2, w3t=w3t, b3=b3)


def _reference_forward(x, params):
    """Pure-JAX reference for correctness check."""
    h = jax.nn.sigmoid(x @ params["w1t"] + params["b1"])
    h = jax.nn.sigmoid(h @ params["w2t"] + params["b2"])
    return jax.nn.sigmoid(h @ params["w3t"] + params["b3"])


if __name__ == "__main__":
    # Small shapes consistent with the GANs_1D discriminator:
    #   input_size = minibatch sample size, hidden_size, output_size = 1
    batch, input_size, hidden_size, output_size = 8, 16, 32, 1

    key = jax.random.PRNGKey(0)
    kx, kp = jax.random.split(key)
    x = jax.random.normal(kx, (batch, input_size), jnp.float32)
    params = init_params(kp, input_size, hidden_size, output_size)

    out = discriminator_forward(x, params)
    out = jax.block_until_ready(out)

    ref = _reference_forward(x, params)
    assert out.shape == (batch, output_size), out.shape
    max_err = float(jnp.max(jnp.abs(out - ref)))
    # approx=True reciprocal (EUP vrcp) has ~2^-12 rel err; sigmoid outputs
    # live in (0,1) so a 2e-3 absolute tolerance is ample.
    assert max_err < 2e-3, f"max abs err {max_err}"

    print("KERNEL_OK")
</pallas_src>

<mosaic_0001>
module attributes {stable_mosaic.version = 11 : i64} {
  func.func @_discriminator_kernel(%arg0: i32, %arg1: memref<128x128xf32, #tpu.memory_space<vmem>>, %arg2: memref<128x128xf32, #tpu.memory_space<vmem>>, %arg3: memref<1x128xf32, #tpu.memory_space<vmem>>, %arg4: memref<128x128xf32, #tpu.memory_space<vmem>>, %arg5: memref<1x128xf32, #tpu.memory_space<vmem>>, %arg6: memref<128x128xf32, #tpu.memory_space<vmem>>, %arg7: memref<1x128xf32, #tpu.memory_space<vmem>>, %arg8: memref<128x128xf32, #tpu.memory_space<vmem>>) attributes {dimension_semantics = [#tpu.dimension_semantics<parallel>], iteration_bounds = array<i64: 1>, scalar_prefetch = 0 : i64, scratch_operands = 0 : i64, tpu.core_type = #tpu.core_type<tc>, window_params = [{transform_indices = @transform_0, window_bounds = array<i64: 128, 128>}, {pipeline_mode = #tpu.pipeline_mode<synchronous>, transform_indices = @transform_1, window_bounds = array<i64: 128, 128>}, {pipeline_mode = #tpu.pipeline_mode<synchronous>, transform_indices = @transform_2, window_bounds = array<i64: 1, 128>}, {pipeline_mode = #tpu.pipeline_mode<synchronous>, transform_indices = @transform_3, window_bounds = array<i64: 128, 128>}, {pipeline_mode = #tpu.pipeline_mode<synchronous>, transform_indices = @transform_4, window_bounds = array<i64: 1, 128>}, {pipeline_mode = #tpu.pipeline_mode<synchronous>, transform_indices = @transform_5, window_bounds = array<i64: 128, 128>}, {pipeline_mode = #tpu.pipeline_mode<synchronous>, transform_indices = @transform_6, window_bounds = array<i64: 1, 128>}, {transform_indices = @transform_7, window_bounds = array<i64: 128, 128>}]} {
    %c0 = arith.constant 0 : index
    %c0_0 = arith.constant 0 : index
    %0 = vector.load %arg1[%c0, %c0_0] : memref<128x128xf32, #tpu.memory_space<vmem>>, vector<128x128xf32>
    %c0_1 = arith.constant 0 : index
    %c0_2 = arith.constant 0 : index
    %1 = vector.load %arg2[%c0_1, %c0_2] : memref<128x128xf32, #tpu.memory_space<vmem>>, vector<128x128xf32>
    %cst = arith.constant dense<0.000000e+00> : vector<128x128xf32>
    %2 = tpu.matmul %0, %1, %cst {dimension_numbers = #tpu.dot_dimension_numbers<[1], [0], [0], [1], [0, 0, 1, 1], [], []>} : vector<128x128xf32>, vector<128x128xf32>, vector<128x128xf32> -> vector<128x128xf32>
    %c0_3 = arith.constant 0 : index
    %c0_4 = arith.constant 0 : index
    %3 = vector.load %arg3[%c0_3, %c0_4] : memref<1x128xf32, #tpu.memory_space<vmem>>, vector<1x128xf32>
    %4 = vector.broadcast %3 : vector<1x128xf32> to vector<128x128xf32>
    %5 = arith.addf %2, %4 : vector<128x128xf32>
    %cst_5 = arith.constant 0.000000e+00 : f32
    %6 = vector.broadcast %cst_5 : f32 to vector<128x128xf32>
    %7 = arith.subf %6, %5 : vector<128x128xf32>
    %8 = math.exp %7 : vector<128x128xf32>
    %cst_6 = arith.constant 1.000000e+00 : f32
    %9 = vector.broadcast %cst_6 : f32 to vector<128x128xf32>
    %10 = arith.addf %9, %8 : vector<128x128xf32>
    %11 = tpu.reciprocal %10 {approx = true} : vector<128x128xf32> -> vector<128x128xf32>
    %c0_7 = arith.constant 0 : index
    %c0_8 = arith.constant 0 : index
    %12 = vector.load %arg4[%c0_7, %c0_8] : memref<128x128xf32, #tpu.memory_space<vmem>>, vector<128x128xf32>
    %cst_9 = arith.constant dense<0.000000e+00> : vector<128x128xf32>
    %13 = tpu.matmul %11, %12, %cst_9 {dimension_numbers = #tpu.dot_dimension_numbers<[1], [0], [0], [1], [0, 0, 1, 1], [], []>} : vector<128x128xf32>, vector<128x128xf32>, vector<128x128xf32> -> vector<128x128xf32>
    %c0_10 = arith.constant 0 : index
    %c0_11 = arith.constant 0 : index
    %14 = vector.load %arg5[%c0_10, %c0_11] : memref<1x128xf32, #tpu.memory_space<vmem>>, vector<1x128xf32>
    %15 = vector.broadcast %14 : vector<1x128xf32> to vector<128x128xf32>
    %16 = arith.addf %13, %15 : vector<128x128xf32>
    %cst_12 = arith.constant 0.000000e+00 : f32
    %17 = vector.broadcast %cst_12 : f32 to vector<128x128xf32>
    %18 = arith.subf %17, %16 : vector<128x128xf32>
    %19 = math.exp %18 : vector<128x128xf32>
    %cst_13 = arith.constant 1.000000e+00 : f32
    %20 = vector.broadcast %cst_13 : f32 to vector<128x128xf32>
    %21 = arith.addf %20, %19 : vector<128x128xf32>
    %22 = tpu.reciprocal %21 {approx = true} : vector<128x128xf32> -> vector<128x128xf32>
    %c0_14 = arith.constant 0 : index
    %c0_15 = arith.constant 0 : index
    %23 = vector.load %arg6[%c0_14, %c0_15] : memref<128x128xf32, #tpu.memory_space<vmem>>, vector<128x128xf32>
    %cst_16 = arith.constant dense<0.000000e+00> : vector<128x128xf32>
    %24 = tpu.matmul %22, %23, %cst_16 {dimension_numbers = #tpu.dot_dimension_numbers<[1], [0], [0], [1], [0, 0, 1, 1], [], []>} : vector<128x128xf32>, vector<128x128xf32>, vector<128x128xf32> -> vector<128x128xf32>
    %c0_17 = arith.constant 0 : index
    %c0_18 = arith.constant 0 : index
    %25 = vector.load %arg7[%c0_17, %c0_18] : memref<1x128xf32, #tpu.memory_space<vmem>>, vector<1x128xf32>
    %26 = vector.broadcast %25 : vector<1x128xf32> to vector<128x128xf32>
    %27 = arith.addf %24, %26 : vector<128x128xf32>
    %cst_19 = arith.constant 0.000000e+00 : f32
    %28 = vector.broadcast %cst_19 : f32 to vector<128x128xf32>
    %29 = arith.subf %28, %27 : vector<128x128xf32>
    %30 = math.exp %29 : vector<128x128xf32>
    %cst_20 = arith.constant 1.000000e+00 : f32
    %31 = vector.broadcast %cst_20 : f32 to vector<128x128xf32>
    %32 = arith.addf %31, %30 : vector<128x128xf32>
    %33 = tpu.reciprocal %32 {approx = true} : vector<128x128xf32> -> vector<128x128xf32>
    %c0_21 = arith.constant 0 : index
    %c0_22 = arith.constant 0 : index
    %34 = vector.load %arg8[%c0_21, %c0_22] : memref<128x128xf32, #tpu.memory_space<vmem>>, vector<128x128xf32>
    tpu.vector_store %arg8[%c0_21, %c0_22], %33 {strides = array<i32>} : memref<128x128xf32, #tpu.memory_space<vmem>>, vector<128x128xf32>,
    return
  }
  func.func @transform_0(%arg0: i32) -> (i32, i32) {
    %c0_i32 = arith.constant 0 : i32
    %c0_i32_0 = arith.constant 0 : i32
    return %arg0, %c0_i32 : i32, i32
  }
  func.func @transform_1(%arg0: i32) -> (i32, i32) {
    %c0_i32 = arith.constant 0 : i32
    %c0_i32_0 = arith.constant 0 : i32
    %c0_i32_1 = arith.constant 0 : i32
    return %c0_i32, %c0_i32_0 : i32, i32
  }
  func.func @transform_2(%arg0: i32) -> (i32, i32) {
    %c0_i32 = arith.constant 0 : i32
    %c0_i32_0 = arith.constant 0 : i32
    %c0_i32_1 = arith.constant 0 : i32
    return %c0_i32, %c0_i32_0 : i32, i32
  }
  func.func @transform_3(%arg0: i32) -> (i32, i32) {
    %c0_i32 = arith.constant 0 : i32
    %c0_i32_0 = arith.constant 0 : i32
    %c0_i32_1 = arith.constant 0 : i32
    return %c0_i32, %c0_i32_0 : i32, i32
  }
  func.func @transform_4(%arg0: i32) -> (i32, i32) {
    %c0_i32 = arith.constant 0 : i32
    %c0_i32_0 = arith.constant 0 : i32
    %c0_i32_1 = arith.constant 0 : i32
    return %c0_i32, %c0_i32_0 : i32, i32
  }
  func.func @transform_5(%arg0: i32) -> (i32, i32) {
    %c0_i32 = arith.constant 0 : i32
    %c0_i32_0 = arith.constant 0 : i32
    %c0_i32_1 = arith.constant 0 : i32
    return %c0_i32, %c0_i32_0 : i32, i32
  }
  func.func @transform_6(%arg0: i32) -> (i32, i32) {
    %c0_i32 = arith.constant 0 : i32
    %c0_i32_0 = arith.constant 0 : i32
    %c0_i32_1 = arith.constant 0 : i32
    return %c0_i32, %c0_i32_0 : i32, i32
  }
  func.func @transform_7(%arg0: i32) -> (i32, i32) {
    %c0_i32 = arith.constant 0 : i32
    %c0_i32_0 = arith.constant 0 : i32
    return %arg0, %c0_i32 : i32, i32
  }
}

</mosaic_0001>

<bundles_post_ra>
// kernel: tpu_custom_call.1
= control target key start
LH: loop header
LB: loop body
LE: loop exit
PB: predicated region body
PF: predicated region fallthrough
CT: control target
= control target key end

     0   :  { %12 = vsyncpa [#allocation3], 0  ;;  %s1623_s0 = inlined_call_operand.hbm [shape: f32[128,128], index: 0, kind: input, shape index: {}]   ;;  %s1624_s1 = inlined_call_operand.hbm [shape: f32[128,128], index: 1, kind: input, shape index: {}]   ;;  %s1625_s2 = inlined_call_operand.vmem [shape: f32[1,128], index: 2, kind: input, shape index: {}]   ;;  %s1626_s3 = inlined_call_operand.hbm [shape: f32[128,128], index: 3, kind: input, shape index: {}]   ;;  %s1627_s4 = inlined_call_operand.vmem [shape: f32[1,128], index: 4, kind: input, shape index: {}]   ;;  %s1628_s5 = inlined_call_operand.hbm [shape: f32[128,128], index: 5, kind: input, shape index: {}]   ;;  %s1629_s6 = inlined_call_operand.vmem [shape: f32[1,128], index: 6, kind: input, shape index: {}]   ;;  %s1630_s7 = inlined_call_operand.hbm [shape: f32[128,128], index: 7, kind: output, shape index: {}]  }
   0x1   :  { %13 = vsyncpa [#allocation6], 0 }
   0x2   :  { %14 = vsyncpa [#allocation9], 0 }
   0x3   :  { %15 = vsyncpa [#allocation4], 0  ;;  %s1483_s24 = smov [#allocation5]   ;;  %s1484_s26 = smov [#allocation2]  }
   0x4   :  { %s33_s25 = sshll.u32 %s1483_s24, 4  ;;  %s21_s27 = sshll.u32 %s1484_s26, 4  ;;  %s34_s25 = int_to_ptr.vmem [resolvable:$true] %s33_s25  ;;  %s22_s27 = int_to_ptr.vmem [resolvable:$true] %s21_s27 }
   0x5   :  { %s1383_s28 = scalar_lea.vmem %s34_s25, 2048  ;;  %p1388_p1 = scmp.lt.s32.totalorder %s34_s25, %s34_s25 }
   0x6   :  { %p1384_p0 = scmp.ne.s32.totalorder %s34_s25, %s1383_s28  ;;  %p1389_p2 = scmp.lt.s32.totalorder %s1383_s28, %s1383_s28 }
   0x8   :  { %p1390_p3 = por %p1389_p2, %p1388_p1 }
   0xa   :  { %p1391_p4 = pnand %p1390_p3, %p1384_p0 }
   0xc   :  { %1394 = shalt.err (!%p1391_p4)
}
   0xd   :  { %s1485_s29 = smov 128   ;;  %s1486_s30 = smov 8  }
   0xe   :  { %39 = dma.hbm_to_vmem [thread:$0]  %s1624_s1, 2048, %s34_s25, [#allocation6], %s1485_s29, %s1485_s29, %s1486_s30  }
   0xf   :  { %s1403_s10 = scalar_lea.vmem %s22_s27, 2048  ;;  %p1408_p6 = scmp.lt.s32.totalorder %s22_s27, %s22_s27 }
  0x10   :  { %p1404_p5 = scmp.ne.s32.totalorder %s22_s27, %s1403_s10  ;;  %p1409_p7 = scmp.lt.s32.totalorder %s1403_s10, %s1403_s10 }
  0x12   :  { %p1410_p8 = por %p1409_p7, %p1408_p6 }
  0x14   :  { %p1411_p9 = pnand %p1410_p8, %p1404_p5 }
  0x16   :  { %1414 = shalt.err (!%p1411_p9)
}
  0x17   :  { %27 = dma.hbm_to_vmem [thread:$0]  %s1623_s0, 2048, %s22_s27, [#allocation3], %s1485_s29, %s1485_s29, %s1486_s30  }
  0x18   :  { %s1487_s13 = smov [#allocation7]   ;;  %s1488_s15 = smov [#allocation8]  }
  0x19   :  { %s47_s14 = sshll.u32 %s1487_s13, 4  ;;  %s61_s16 = sshll.u32 %s1488_s15, 4  ;;  %s48_s14 = int_to_ptr.vmem [resolvable:$true] %s47_s14  ;;  %s62_s16 = int_to_ptr.vmem [resolvable:$true] %s61_s16 }
  0x1a   :  { %s1423_s1 = scalar_lea.vmem %s48_s14, 2048  ;;  %p1428_p11 = scmp.lt.s32.totalorder %s48_s14, %s48_s14 }
  0x1b   :  { %p1424_p10 = scmp.ne.s32.totalorder %s48_s14, %s1423_s1  ;;  %p1429_p12 = scmp.lt.s32.totalorder %s1423_s1, %s1423_s1 }
  0x1d   :  { %p1430_p13 = por %p1429_p12, %p1428_p11 }
  0x1f   :  { %p1431_p0 = pnand %p1430_p13, %p1424_p10 }
  0x21   :  { %1434 = shalt.err (!%p1431_p0)
}
  0x22   :  { %53 = dma.hbm_to_vmem [thread:$0]  %s1626_s3, 2048, %s48_s14, [#allocation6], %s1485_s29, %s1485_s29, %s1486_s30  }
  0x23   :  { %s1443_s0 = scalar_lea.vmem %s62_s16, 2048  ;;  %p1448_p2 = scmp.lt.s32.totalorder %s62_s16, %s62_s16 }
  0x24   :  { %p1444_p1 = scmp.ne.s32.totalorder %s62_s16, %s1443_s0  ;;  %p1449_p3 = scmp.lt.s32.totalorder %s1443_s0, %s1443_s0 }
  0x26   :  { %p1450_p4 = por %p1449_p3, %p1448_p2 }
  0x28   :  { %p1451_p5 = pnand %p1450_p4, %p1444_p1 }
  0x2a   :  { %1454 = shalt.err (!%p1451_p5)
}
  0x2b   :  { %67 = dma.hbm_to_vmem [thread:$0]  %s1628_s5, 2048, %s62_s16, [#allocation9], %s1485_s29, %s1485_s29, %s1486_s30  }
  0x2c   :  { %1475 = dma.done.wait [#allocation3], 2048  }
  0x2d   :  { %1476 = vsyncadd [#allocation3], 4294965248 }
  0x2e   :  { %1477 = dma.done.wait [#allocation6], 4096  }
  0x2f   :  { %1478 = vsyncadd [#allocation6], 4294963200 }
  0x30   :  { %1479 = dma.done.wait [#allocation9], 2048  }
  0x31   :  { %1480 = vsyncadd [#allocation9], 4294965248  ;;  %v113_v0 = vld [vmem:[#allocation5 + $0x78] sm:$0xff]  ;;  %v112_v1 = vld [vmem:[#allocation5 + $0x70] sm:$0xff] }
  0x32   :  { %976 = vmatprep.subr.mxu0 %v113_v0  ;;  %v111_v2 = vld [vmem:[#allocation5 + $0x68] sm:$0xff]  ;;  %v110_v3 = vld [vmem:[#allocation5 + $0x60] sm:$0xff]  ;;  %v109_v5 = vld [vmem:[#allocation5 + $0x58] sm:$0xff] }
  0x33   :  { %977 = vmatpush3.msra.mxu0 %v113_v0  ;;  %v82_v4 = vld [vmem:[#allocation2] sm:$0xff]  ;;  %v108_v6 = vld [vmem:[#allocation5 + $0x50] sm:$0xff]  ;;  %v107_v7 = vld [vmem:[#allocation5 + $0x48] sm:$0xff] }
  0x34   :  { %978 = vmatprep.subr.mxu0 %v112_v1  ;;  %1008 = vmatprep.mubr.f32.mxu0 %v82_v4  ;;  %v106_v8 = vld [vmem:[#allocation5 + $0x40] sm:$0xff]  ;;  %v105_v9 = vld [vmem:[#allocation5 + $0x38] sm:$0xff]  ;;  %v104_v10 = vld [vmem:[#allocation5 + $0x30] sm:$0xff] }
  0x35   :  { %979 = vmatpush3.msra.mxu0 %v112_v1  ;;  %v103_v11 = vld [vmem:[#allocation5 + $0x28] sm:$0xff]  ;;  %v102_v12 = vld [vmem:[#allocation5 + $0x20] sm:$0xff]  ;;  %v101_v13 = vld [vmem:[#allocation5 + $0x18] sm:$0xff] }
  0x36   :  { %980 = vmatprep.subr.mxu0 %v111_v2  ;;  %v100_v14 = vld [vmem:[#allocation5 + $0x10] sm:$0xff]  ;;  %v99_v15 = vld [vmem:[#allocation5 + $0x8] sm:$0xff]  ;;  %v98_v16 = vld [vmem:[#allocation5] sm:$0xff] }
  0x37   :  { %981 = vmatpush3.msra.mxu0 %v111_v2  ;;  %v83_v17 = vld [vmem:[#allocation2 + $0x8] sm:$0xff]  ;;  %v84_v18 = vld [vmem:[#allocation2 + $0x10] sm:$0xff]  ;;  %v85_v19 = vld [vmem:[#allocation2 + $0x18] sm:$0xff] }
  0x38   :  { %982 = vmatprep.subr.mxu0 %v110_v3  ;;  %v86_v20 = vld [vmem:[#allocation2 + $0x20] sm:$0xff]  ;;  %v87_v21 = vld [vmem:[#allocation2 + $0x28] sm:$0xff]  ;;  %v88_v22 = vld [vmem:[#allocation2 + $0x30] sm:$0xff] }
  0x39   :  { %983 = vmatpush3.msra.mxu0 %v110_v3  ;;  %v89_v23 = vld [vmem:[#allocation2 + $0x38] sm:$0xff]  ;;  %v90_v24 = vld [vmem:[#allocation2 + $0x40] sm:$0xff]  ;;  %v91_v25 = vld [vmem:[#allocation2 + $0x48] sm:$0xff] }
  0x3a   :  { %984 = vmatprep.subr.mxu0 %v109_v5  ;;  %v92_v26 = vld [vmem:[#allocation2 + $0x50] sm:$0xff]  ;;  %v93_v27 = vld [vmem:[#allocation2 + $0x58] sm:$0xff]  ;;  %v94_v28 = vld [vmem:[#allocation2 + $0x60] sm:$0xff] }
  0x3b   :  { %985 = vmatpush3.msra.mxu0 %v109_v5  ;;  %v95_v29 = vld [vmem:[#allocation2 + $0x68] sm:$0xff]  ;;  %v96_v30 = vld [vmem:[#allocation2 + $0x70] sm:$0xff]  ;;  %v97_v31 = vld [vmem:[#allocation2 + $0x78] sm:$0xff] }
  0x3c   :  { %986 = vmatprep.subr.mxu0 %v108_v6  ;;  %v361_v32 = vld [vmem:[#allocation7 + $0x78] sm:$0xff]  ;;  %v360_v33 = vld [vmem:[#allocation7 + $0x70] sm:$0xff]  ;;  %v359_v34 = vld [vmem:[#allocation7 + $0x68] sm:$0xff] }
  0x3d   :  { %987 = vmatpush3.msra.mxu0 %v108_v6  ;;  %1032 = vmatprep.subr.mxu1 %v361_v32  ;;  %v358_v35 = vld [vmem:[#allocation7 + $0x60] sm:$0xff]  ;;  %v357_v36 = vld [vmem:[#allocation7 + $0x58] sm:$0xff]  ;;  %v356_v37 = vld [vmem:[#allocation7 + $0x50] sm:$0xff] }
  0x3e   :  { %988 = vmatprep.subr.mxu0 %v107_v7  ;;  %1033 = vmatpush3.msra.mxu1 %v361_v32  ;;  %v355_v38 = vld [vmem:[#allocation7 + $0x48] sm:$0xff]  ;;  %v354_v39 = vld [vmem:[#allocation7 + $0x40] sm:$0xff]  ;;  %v353_v40 = vld [vmem:[#allocation7 + $0x38] sm:$0xff] }
  0x3f   :  { %989 = vmatpush3.msra.mxu0 %v107_v7  ;;  %1034 = vmatprep.subr.mxu1 %v360_v33  ;;  %v352_v41 = vld [vmem:[#allocation7 + $0x30] sm:$0xff]  ;;  %v351_v42 = vld [vmem:[#allocation7 + $0x28] sm:$0xff]  ;;  %v350_v43 = vld [vmem:[#allocation7 + $0x20] sm:$0xff] }
  0x40   :  { %990 = vmatprep.subr.mxu0 %v106_v8  ;;  %1035 = vmatpush3.msra.mxu1 %v360_v33  ;;  %v349_v44 = vld [vmem:[#allocation7 + $0x18] sm:$0xff]  ;;  %v348_v45 = vld [vmem:[#allocation7 + $0x10] sm:$0xff]  ;;  %v347_v46 = vld [vmem:[#allocation7 + $0x8] sm:$0xff] }
  0x41   :  { %991 = vmatpush3.msra.mxu0 %v106_v8  ;;  %1036 = vmatprep.subr.mxu1 %v359_v34  ;;  %v346_v47 = vld [vmem:[#allocation7] sm:$0xff] }
  0x42   :  { %992 = vmatprep.subr.mxu0 %v105_v9  ;;  %1037 = vmatpush3.msra.mxu1 %v359_v34  ;;  %v1557_v48 = vld [vmem:[%s1625_s2] ss:$0 sm:$0xff] }
  0x43   :  { %993 = vmatpush3.msra.mxu0 %v105_v9  ;;  %1038 = vmatprep.subr.mxu1 %v358_v35 }
  0x44   :  { %994 = vmatprep.subr.mxu0 %v104_v10  ;;  %1039 = vmatpush3.msra.mxu1 %v358_v35 }
  0x45   :  { %995 = vmatpush3.msra.mxu0 %v104_v10  ;;  %1040 = vmatprep.subr.mxu1 %v357_v36 }
  0x46   :  { %996 = vmatprep.subr.mxu0 %v103_v11  ;;  %1041 = vmatpush3.msra.mxu1 %v357_v36 }
  0x47   :  { %997 = vmatpush3.msra.mxu0 %v103_v11  ;;  %1042 = vmatprep.subr.mxu1 %v356_v37 }
  0x48   :  { %998 = vmatprep.subr.mxu0 %v102_v12  ;;  %1043 = vmatpush3.msra.mxu1 %v356_v37 }
  0x49   :  { %999 = vmatpush3.msra.mxu0 %v102_v12  ;;  %1044 = vmatprep.subr.mxu1 %v355_v38 }
  0x4a   :  { %1000 = vmatprep.subr.mxu0 %v101_v13  ;;  %1045 = vmatpush3.msra.mxu1 %v355_v38 }
  0x4b   :  { %1001 = vmatpush3.msra.mxu0 %v101_v13  ;;  %1046 = vmatprep.subr.mxu1 %v354_v39 }
  0x4c   :  { %1002 = vmatprep.subr.mxu0 %v100_v14  ;;  %1047 = vmatpush3.msra.mxu1 %v354_v39 }
  0x4d   :  { %1003 = vmatpush3.msra.mxu0 %v100_v14  ;;  %1048 = vmatprep.subr.mxu1 %v353_v40 }
  0x4e   :  { %1004 = vmatprep.subr.mxu0 %v99_v15  ;;  %1049 = vmatpush3.msra.mxu1 %v353_v40 }
  0x4f   :  { %1005 = vmatpush3.msra.mxu0 %v99_v15  ;;  %1050 = vmatprep.subr.mxu1 %v352_v41 }
  0x50   :  { %1006 = vmatprep.subr.mxu0 %v98_v16  ;;  %1051 = vmatpush3.msra.mxu1 %v352_v41 }
  0x51   :  { %1007 = vmatpush3.msra.mxu0 %v98_v16  ;;  %1052 = vmatprep.subr.mxu1 %v351_v42 }
  0x52   :  { %1009 = vmatmul.mubr.f32.vlgmr.msra.gmra.mxu0 %v83_v17  ;;  %1053 = vmatpush3.msra.mxu1 %v351_v42 }
  0x53   :  { %1011 = vmatprep.mubr.f32.mxu0 %v84_v18  ;;  %1054 = vmatprep.subr.mxu1 %v350_v43 }
  0x54   :  { %1055 = vmatpush3.msra.mxu1 %v350_v43 }
  0x55   :  { %1056 = vmatprep.subr.mxu1 %v349_v44 }
  0x56   :  { %1012 = vmatmul.mubr.f32.gmra.mxu0 %v85_v19  ;;  %1057 = vmatpush3.msra.mxu1 %v349_v44 }
  0x57   :  { %1014 = vmatprep.mubr.f32.mxu0 %v86_v20  ;;  %1058 = vmatprep.subr.mxu1 %v348_v45 }
  0x58   :  { %1059 = vmatpush3.msra.mxu1 %v348_v45 }
  0x59   :  { %1060 = vmatprep.subr.mxu1 %v347_v46 }
  0x5a   :  { %1015 = vmatmul.mubr.f32.gmra.mxu0 %v87_v21  ;;  %1061 = vmatpush3.msra.mxu1 %v347_v46 }
  0x5b   :  { %1017 = vmatprep.mubr.f32.mxu0 %v88_v22  ;;  %1062 = vmatprep.subr.mxu1 %v346_v47 }
  0x5c   :  { %1063 = vmatpush3.msra.mxu1 %v346_v47 }
  0x5e   :  { %1018 = vmatmul.mubr.f32.gmra.mxu0 %v89_v23 }
  0x5f   :  { %1020 = vmatprep.mubr.f32.mxu0 %v90_v24 }
  0x62   :  { %1021 = vmatmul.mubr.f32.gmra.mxu0 %v91_v25 }
  0x63   :  { %1023 = vmatprep.mubr.f32.mxu0 %v92_v26 }
  0x66   :  { %1024 = vmatmul.mubr.f32.gmra.mxu0 %v93_v27 }
  0x67   :  { %1026 = vmatprep.mubr.f32.mxu0 %v94_v28 }
  0x6a   :  { %1027 = vmatmul.mubr.f32.gmra.mxu0 %v95_v29 }
  0x6b   :  { %1029 = vmatprep.mubr.f32.mxu0 %v96_v30 }
  0x6e   :  { %1030 = vmatmul.mubr.f32.gmra.mxu0 %v97_v31 }
 0x112   :  { %v1010_v49 = vpop.f32.mrf.mxu0 }
 0x113   :  { %v193_v50 = vadd.f32 %v1010_v49, %v1557_v48 }
 0x114   :  { %v187_v51 = vpop.f32.mrf.mxu0 }
 0x115   :  { %v267_v52 = vsub.f32 0.0, %v193_v50  ;;  %v188_v53 = vadd.f32 %v1557_v48, %v187_v51 }
 0x116   :  { %v1013_v54 = vpop.f32.mrf.mxu0 }
 0x117   :  { %v284_v55 = vmul.f32 1.442695, %v267_v52  ;;  %v266_v56 = vsub.f32 0.0, %v188_v53  ;;  %v203_v57 = vadd.f32 %v1013_v54, %v1557_v48 }
 0x118   :  { %v197_v58 = vpop.f32.mrf.mxu0 }
 0x119   :  { %1183 = vpow2.f32 %v284_v55  ;;  %v282_v59 = vmul.f32 1.442695, %v266_v56  ;;  %v269_v60 = vsub.f32 0.0, %v203_v57  ;;  %v198_v61 = vadd.f32 %v1557_v48, %v197_v58 }
 0x11a   :  { %v1016_v62 = vpop.f32.mrf.mxu0 }
 0x11b   :  { %1185 = vpow2.f32 %v282_v59  ;;  %v288_v63 = vmul.f32 1.442695, %v269_v60  ;;  %v268_v0 = vsub.f32 0.0, %v198_v61  ;;  %v213_v1 = vadd.f32 %v1016_v62, %v1557_v48 }
 0x11c   :  { %v207_v2 = vpop.f32.mrf.mxu0 }
 0x11d   :  { %1187 = vpow2.f32 %v288_v63  ;;  %v286_v3 = vmul.f32 1.442695, %v268_v0  ;;  %v271_v4 = vsub.f32 0.0, %v213_v1  ;;  %v208_v5 = vadd.f32 %v1557_v48, %v207_v2 }
 0x11e   :  { %v1019_v6 = vpop.f32.mrf.mxu0 }
 0x11f   :  { %1189 = vpow2.f32 %v286_v3  ;;  %v292_v7 = vmul.f32 1.442695, %v271_v4  ;;  %v270_v8 = vsub.f32 0.0, %v208_v5  ;;  %v223_v9 = vadd.f32 %v1019_v6, %v1557_v48 }
 0x120   :  { %v217_v10 = vpop.f32.mrf.mxu0 }
 0x121   :  { %1191 = vpow2.f32 %v292_v7  ;;  %v290_v11 = vmul.f32 1.442695, %v270_v8  ;;  %v273_v12 = vsub.f32 0.0, %v223_v9  ;;  %v218_v13 = vadd.f32 %v1557_v48, %v217_v10 }
 0x122   :  { %v1022_v14 = vpop.f32.mrf.mxu0 }
 0x123   :  { %1193 = vpow2.f32 %v290_v11  ;;  %v296_v15 = vmul.f32 1.442695, %v273_v12  ;;  %v272_v16 = vsub.f32 0.0, %v218_v13  ;;  %v233_v17 = vadd.f32 %v1022_v14, %v1557_v48 }
 0x124   :  { %v227_v18 = vpop.f32.mrf.mxu0 }
 0x125   :  { %1195 = vpow2.f32 %v296_v15  ;;  %v294_v19 = vmul.f32 1.442695, %v272_v16  ;;  %v275_v20 = vsub.f32 0.0, %v233_v17  ;;  %v228_v21 = vadd.f32 %v1557_v48, %v227_v18 }
 0x126   :  { %v1184_v22 = vpop.eup %1183  ;;  %v1025_v23 = vpop.f32.mrf.mxu0 }
 0x127   :  { %v315_v24 = vadd.f32 1.0, %v1184_v22  ;;  %1197 = vpow2.f32 %v294_v19  ;;  %v300_v25 = vmul.f32 1.442695, %v275_v20  ;;  %v274_v26 = vsub.f32 0.0, %v228_v21 }
 0x128   :  { %v1186_v27 = vpop.eup %1185  ;;  %v243_v28 = vadd.f32 %v1025_v23, %v1557_v48  ;;  %v237_v29 = vpop.f32.mrf.mxu0 }
 0x129   :  { %1199 = vrcp.f32 %v315_v24  ;;  %v298_v30 = vmul.f32 1.442695, %v274_v26  ;;  %v238_v31 = vadd.f32 %v1557_v48, %v237_v29  ;;  %v314_v32 = vadd.f32 1.0, %v1186_v27 }
 0x12a   :  { %v1188_v33 = vpop.eup %1187  ;;  %1201 = vpow2.f32 %v300_v25  ;;  %v277_v34 = vsub.f32 0.0, %v243_v28  ;;  %v1028_v35 = vpop.f32.mrf.mxu0 }
 0x12b   :  { %v317_v36 = vadd.f32 1.0, %v1188_v33  ;;  %1203 = vpow2.f32 %v298_v30  ;;  %v276_v37 = vsub.f32 0.0, %v238_v31  ;;  %v253_v38 = vadd.f32 %v1028_v35, %v1557_v48  ;;  %v609_v33 = vld [vmem:[#allocation8 + $0x78] sm:$0xff]  ;;  %v607_v35 = vld [vmem:[#allocation8 + $0x68] sm:$0xff] }
 0x12c   :  { %v1190_v39 = vpop.eup %1189  ;;  %v304_v40 = vmul.f32 1.442695, %v277_v34  ;;  %v247_v41 = vpop.f32.mrf.mxu0  ;;  %1205 = vrcp.f32 %v314_v32  ;;  %1088 = vmatprep.subr.mxu0 %v609_v33  ;;  %1144 = vmatprep.subr.mxu1 %v609_v33  ;;  %v608_v34 = vld [vmem:[#allocation8 + $0x70] sm:$0xff] }
 0x12d   :  { %1207 = vrcp.f32 %v317_v36  ;;  %v316_v42 = vadd.f32 1.0, %v1190_v39  ;;  %v302_v43 = vmul.f32 1.442695, %v276_v37  ;;  %v279_v44 = vsub.f32 0.0, %v253_v38  ;;  %1089 = vmatpush3.msra.mxu0 %v609_v33  ;;  %v606_v36 = vld [vmem:[#allocation8 + $0x60] sm:$0xff]  ;;  %v605_v37 = vld [vmem:[#allocation8 + $0x58] sm:$0xff] }
 0x12e   :  { %v1192_v45 = vpop.eup %1191  ;;  %1209 = vpow2.f32 %v304_v40  ;;  %v248_v46 = vadd.f32 %v1557_v48, %v247_v41  ;;  %v1031_v47 = vpop.f32.mrf.mxu0  ;;  %1090 = vmatprep.subr.mxu0 %v608_v34  ;;  %v604_v38 = vld [vmem:[#allocation8 + $0x50] sm:$0xff]  ;;  %v603_v39 = vld [vmem:[#allocation8 + $0x48] sm:$0xff]  ;;  %v602_v40 = vld [vmem:[#allocation8 + $0x40] sm:$0xff] }
 0x12f   :  { %1211 = vrcp.f32 %v316_v42  ;;  %v308_v49 = vmul.f32 1.442695, %v279_v44  ;;  %v263_v50 = vadd.f32 %v1031_v47, %v1557_v48  ;;  %v319_v54 = vadd.f32 1.0, %v1192_v45  ;;  %1091 = vmatpush3.msra.mxu0 %v608_v34  ;;  %v601_v41 = vld [vmem:[#allocation8 + $0x38] sm:$0xff]  ;;  %v600_v42 = vld [vmem:[#allocation8 + $0x30] sm:$0xff]  ;;  %v598_v44 = vld [vmem:[#allocation8 + $0x20] sm:$0xff] }
 0x130   :  { %v1194_v51 = vpop.eup %1193  ;;  %1213 = vpow2.f32 %v302_v43  ;;  %v278_v52 = vsub.f32 0.0, %v248_v46  ;;  %v257_v53 = vpop.f32.mrf.mxu0  ;;  %1092 = vmatprep.subr.mxu0 %v607_v35  ;;  %v599_v43 = vld [vmem:[#allocation8 + $0x28] sm:$0xff]  ;;  %v597_v45 = vld [vmem:[#allocation8 + $0x18] sm:$0xff]  ;;  %v596_v46 = vld [vmem:[#allocation8 + $0x10] sm:$0xff] }
 0x131   :  { %v318_v55 = vadd.f32 1.0, %v1194_v51  ;;  %v281_v56 = vsub.f32 0.0, %v263_v50  ;;  %v258_v57 = vadd.f32 %v1557_v48, %v257_v53  ;;  %1215 = vpow2.f32 %v308_v49  ;;  %1093 = vmatpush3.msra.mxu0 %v607_v35  ;;  %v595_v47 = vld [vmem:[#allocation8 + $0x8] sm:$0xff]  ;;  %v594_v49 = vld [vmem:[#allocation8] sm:$0xff] }
 0x132   :  { %v1196_v58 = vpop.eup %1195  ;;  %v306_v59 = vmul.f32 1.442695, %v278_v52  ;;  %1094 = vmatprep.subr.mxu0 %v606_v36  ;;  %v1578_v50 = vld [vmem:[%s1627_s4] ss:$0 sm:$0xff] }
 0x133   :  { %1217 = vrcp.f32 %v318_v55  ;;  %v312_v60 = vmul.f32 1.442695, %v281_v56  ;;  %v280_v61 = vsub.f32 0.0, %v258_v57  ;;  %v321_v63 = vadd.f32 1.0, %v1196_v58  ;;  %1095 = vmatpush3.msra.mxu0 %v606_v36 }
 0x134   :  { %v1198_v62 = vpop.eup %1197  ;;  %1219 = vpow2.f32 %v306_v59  ;;  %1096 = vmatprep.subr.mxu0 %v605_v37 }
 0x135   :  { %1221 = vrcp.f32 %v319_v54  ;;  %v320_v0 = vadd.f32 1.0, %v1198_v62  ;;  %v310_v1 = vmul.f32 1.442695, %v280_v61  ;;  %1097 = vmatpush3.msra.mxu0 %v605_v37 }
 0x136   :  { %v1200_v2 = vpop.eup %1199  ;;  %1223 = vpow2.f32 %v312_v60  ;;  %1098 = vmatprep.subr.mxu0 %v604_v38 }
 0x137   :  { %v1202_v3 = vpop.eup %1201  ;;  %1225 = vrcp.f32 %v320_v0  ;;  %1099 = vmatpush3.msra.mxu0 %v604_v38 }
 0x138   :  { %v1204_v4 = vpop.eup %1203  ;;  %1227 = vpow2.f32 %v310_v1  ;;  %v323_v48 = vadd.f32 1.0, %v1202_v3  ;;  %1100 = vmatprep.subr.mxu0 %v603_v39 }
 0x139   :  { %v1206_v5 = vpop.eup %1205  ;;  %1229 = vrcp.f32 %v321_v63  ;;  %v322_v6 = vadd.f32 1.0, %v1204_v4  ;;  %1101 = vmatpush3.msra.mxu0 %v603_v39 }
 0x13a   :  { %v1208_v7 = vpop.eup %1207  ;;  %1064 = vmatprep.mubr.f32.mxu1 %v1206_v5  ;;  %1102 = vmatprep.subr.mxu0 %v602_v40 }
 0x13b   :  { %v1210_v8 = vpop.eup %1209  ;;  %1231 = vrcp.f32 %v322_v6  ;;  %1065 = vmatmul.mubr.f32.vlgmr.msra.gmra.mxu1 %v1200_v2  ;;  %1103 = vmatpush3.msra.mxu0 %v602_v40 }
 0x13c   :  { %v1212_v9 = vpop.eup %1211  ;;  %1233 = vrcp.f32 %v323_v48  ;;  %v325_v11 = vadd.f32 1.0, %v1210_v8  ;;  %1160 = vmatpush3.msra.mxu1 %v609_v33  ;;  %1104 = vmatprep.subr.mxu0 %v601_v41 }
 0x13d   :  { %v1214_v10 = vpop.eup %1213  ;;  %1067 = vmatprep.mubr.f32.mxu1 %v1212_v9  ;;  %1145 = vmatprep.subr.mxu1 %v608_v34 }
 0x13e   :  { %v324_v12 = vadd.f32 1.0, %v1214_v10  ;;  %v1216_v13 = vpop.eup %1215  ;;  %1161 = vmatpush3.msra.mxu1 %v608_v34  ;;  %1105 = vmatpush3.msra.mxu0 %v601_v41 }
 0x13f   :  { %1068 = vmatmul.mubr.f32.gmra.mxu1 %v1208_v7  ;;  %v327_v16 = vadd.f32 1.0, %v1216_v13  ;;  %1146 = vmatprep.subr.mxu1 %v607_v35 }
 0x140   :  { %v1218_v14 = vpop.eup %1217  ;;  %1235 = vrcp.f32 %v324_v12  ;;  %1162 = vmatpush3.msra.mxu1 %v607_v35  ;;  %1106 = vmatprep.subr.mxu0 %v600_v42 }
 0x141   :  { %v1220_v15 = vpop.eup %1219  ;;  %1237 = vrcp.f32 %v325_v11  ;;  %1070 = vmatprep.mubr.f32.mxu1 %v1218_v14  ;;  %1147 = vmatprep.subr.mxu1 %v606_v36 }
 0x142   :  { %v1222_v17 = vpop.eup %1221  ;;  %v326_v18 = vadd.f32 1.0, %v1220_v15  ;;  %1163 = vmatpush3.msra.mxu1 %v606_v36  ;;  %1107 = vmatpush3.msra.mxu0 %v600_v42 }
 0x143   :  { %v1224_v19 = vpop.eup %1223  ;;  %1071 = vmatmul.mubr.f32.gmra.mxu1 %v1222_v17  ;;  %1148 = vmatprep.subr.mxu1 %v605_v37 }
 0x144   :  { %v1226_v20 = vpop.eup %1225  ;;  %1239 = vrcp.f32 %v326_v18  ;;  %v329_v22 = vadd.f32 1.0, %v1224_v19  ;;  %1164 = vmatpush3.msra.mxu1 %v605_v37  ;;  %1108 = vmatprep.subr.mxu0 %v599_v43 }
 0x145   :  { %v1228_v21 = vpop.eup %1227  ;;  %1241 = vrcp.f32 %v327_v16  ;;  %1073 = vmatprep.mubr.f32.mxu1 %v1226_v20  ;;  %1149 = vmatprep.subr.mxu1 %v604_v38 }
 0x146   :  { %v1230_v23 = vpop.eup %1229  ;;  %v328_v24 = vadd.f32 1.0, %v1228_v21  ;;  %1165 = vmatpush3.msra.mxu1 %v604_v38  ;;  %1109 = vmatpush3.msra.mxu0 %v599_v43 }
 0x147   :  { %1074 = vmatmul.mubr.f32.gmra.mxu1 %v1230_v23  ;;  %1150 = vmatprep.subr.mxu1 %v603_v39 }
 0x148   :  { %v1232_v25 = vpop.eup %1231  ;;  %1243 = vrcp.f32 %v328_v24  ;;  %1166 = vmatpush3.msra.mxu1 %v603_v39  ;;  %1110 = vmatprep.subr.mxu0 %v598_v44 }
 0x149   :  { %1245 = vrcp.f32 %v329_v22  ;;  %1076 = vmatprep.mubr.f32.mxu1 %v1232_v25  ;;  %v1234_v26 = vpop.eup %1233  ;;  %1151 = vmatprep.subr.mxu1 %v602_v40 }
 0x14a   :  { %1167 = vmatpush3.msra.mxu1 %v602_v40  ;;  %1111 = vmatpush3.msra.mxu0 %v598_v44 }
 0x14b   :  { %1077 = vmatmul.mubr.f32.gmra.mxu1 %v1234_v26  ;;  %1152 = vmatprep.subr.mxu1 %v601_v41 }
 0x14c   :  { %1168 = vmatpush3.msra.mxu1 %v601_v41  ;;  %1112 = vmatprep.subr.mxu0 %v597_v45 }
 0x14d   :  { %v1236_v27 = vpop.eup %1235  ;;  %1153 = vmatprep.subr.mxu1 %v600_v42  ;;  %1113 = vmatpush3.msra.mxu0 %v597_v45 }
 0x14e   :  { %v1238_v28 = vpop.eup %1237  ;;  %1079 = vmatprep.mubr.f32.mxu1 %v1236_v27  ;;  %1169 = vmatpush3.msra.mxu1 %v600_v42 }
 0x14f   :  { %1080 = vmatmul.mubr.f32.gmra.mxu1 %v1238_v28  ;;  %1154 = vmatprep.subr.mxu1 %v599_v43 }
 0x150   :  { %1170 = vmatpush3.msra.mxu1 %v599_v43  ;;  %1114 = vmatprep.subr.mxu0 %v596_v46 }
 0x151   :  { %v1240_v29 = vpop.eup %1239  ;;  %1155 = vmatprep.subr.mxu1 %v598_v44  ;;  %1115 = vmatpush3.msra.mxu0 %v596_v46 }
 0x152   :  { %v1242_v30 = vpop.eup %1241  ;;  %1082 = vmatprep.mubr.f32.mxu1 %v1240_v29  ;;  %1171 = vmatpush3.msra.mxu1 %v598_v44 }
 0x153   :  { %1083 = vmatmul.mubr.f32.gmra.mxu1 %v1242_v30  ;;  %1156 = vmatprep.subr.mxu1 %v597_v45 }
 0x154   :  { %1172 = vmatpush3.msra.mxu1 %v597_v45  ;;  %1116 = vmatprep.subr.mxu0 %v595_v47 }
 0x155   :  { %v1244_v31 = vpop.eup %1243  ;;  %1157 = vmatprep.subr.mxu1 %v596_v46  ;;  %1117 = vmatpush3.msra.mxu0 %v595_v47 }
 0x156   :  { %v1246_v32 = vpop.eup %1245  ;;  %1085 = vmatprep.mubr.f32.mxu1 %v1244_v31  ;;  %1173 = vmatpush3.msra.mxu1 %v596_v46 }
 0x157   :  { %1086 = vmatmul.mubr.f32.gmra.mxu1 %v1246_v32  ;;  %1158 = vmatprep.subr.mxu1 %v595_v47 }
 0x158   :  { %1174 = vmatpush3.msra.mxu1 %v595_v47  ;;  %1118 = vmatprep.subr.mxu0 %v594_v49 }
 0x159   :  { %1159 = vmatprep.subr.mxu1 %v594_v49  ;;  %1119 = vmatpush3.msra.mxu0 %v594_v49 }
 0x15a   :  { %1175 = vmatpush3.msra.mxu1 %v594_v49 }
 0x1fb   :  { %v1066_v51 = vpop.f32.mrf.mxu1 }
 0x1fc   :  { %v441_v52 = vadd.f32 %v1066_v51, %v1578_v50 }
 0x1fd   :  { %v435_v53 = vpop.f32.mrf.mxu1 }
 0x1fe   :  { %v515_v54 = vsub.f32 0.0, %v441_v52  ;;  %v436_v55 = vadd.f32 %v1578_v50, %v435_v53 }
 0x1ff   :  { %v1069_v56 = vpop.f32.mrf.mxu1 }
 0x200   :  { %v532_v57 = vmul.f32 1.442695, %v515_v54  ;;  %v514_v58 = vsub.f32 0.0, %v436_v55  ;;  %v451_v59 = vadd.f32 %v1069_v56, %v1578_v50 }
 0x201   :  { %v445_v60 = vpop.f32.mrf.mxu1 }
 0x202   :  { %1247 = vpow2.f32 %v532_v57  ;;  %v530_v61 = vmul.f32 1.442695, %v514_v58  ;;  %v517_v62 = vsub.f32 0.0, %v451_v59  ;;  %v446_v63 = vadd.f32 %v1578_v50, %v445_v60 }
 0x203   :  { %v1072_v0 = vpop.f32.mrf.mxu1 }
 0x204   :  { %1249 = vpow2.f32 %v530_v61  ;;  %v536_v1 = vmul.f32 1.442695, %v517_v62  ;;  %v516_v2 = vsub.f32 0.0, %v446_v63  ;;  %v461_v3 = vadd.f32 %v1072_v0, %v1578_v50 }
 0x205   :  { %v455_v4 = vpop.f32.mrf.mxu1 }
 0x206   :  { %1251 = vpow2.f32 %v536_v1  ;;  %v534_v5 = vmul.f32 1.442695, %v516_v2  ;;  %v519_v48 = vsub.f32 0.0, %v461_v3  ;;  %v456_v6 = vadd.f32 %v1578_v50, %v455_v4 }
 0x207   :  { %v1075_v7 = vpop.f32.mrf.mxu1 }
 0x208   :  { %1253 = vpow2.f32 %v534_v5  ;;  %v540_v8 = vmul.f32 1.442695, %v519_v48  ;;  %v518_v9 = vsub.f32 0.0, %v456_v6  ;;  %v471_v10 = vadd.f32 %v1075_v7, %v1578_v50 }
 0x209   :  { %v465_v11 = vpop.f32.mrf.mxu1 }
 0x20a   :  { %1255 = vpow2.f32 %v540_v8  ;;  %v538_v12 = vmul.f32 1.442695, %v518_v9  ;;  %v521_v13 = vsub.f32 0.0, %v471_v10  ;;  %v466_v14 = vadd.f32 %v1578_v50, %v465_v11 }
 0x20b   :  { %v1078_v15 = vpop.f32.mrf.mxu1 }
 0x20c   :  { %1257 = vpow2.f32 %v538_v12  ;;  %v544_v16 = vmul.f32 1.442695, %v521_v13  ;;  %v520_v17 = vsub.f32 0.0, %v466_v14  ;;  %v481_v18 = vadd.f32 %v1078_v15, %v1578_v50 }
 0x20d   :  { %v475_v19 = vpop.f32.mrf.mxu1 }
 0x20e   :  { %1259 = vpow2.f32 %v544_v16  ;;  %v542_v20 = vmul.f32 1.442695, %v520_v17  ;;  %v523_v21 = vsub.f32 0.0, %v481_v18  ;;  %v476_v22 = vadd.f32 %v1578_v50, %v475_v19 }
 0x20f   :  { %v1248_v23 = vpop.eup %1247  ;;  %v1081_v24 = vpop.f32.mrf.mxu1 }
 0x210   :  { %v563_v25 = vadd.f32 1.0, %v1248_v23  ;;  %1261 = vpow2.f32 %v542_v20  ;;  %v548_v26 = vmul.f32 1.442695, %v523_v21  ;;  %v522_v27 = vsub.f32 0.0, %v476_v22 }
 0x211   :  { %v1250_v28 = vpop.eup %1249  ;;  %v491_v29 = vadd.f32 %v1081_v24, %v1578_v50  ;;  %v485_v30 = vpop.f32.mrf.mxu1 }
 0x212   :  { %1263 = vrcp.f32 %v563_v25  ;;  %v562_v31 = vadd.f32 1.0, %v1250_v28  ;;  %v546_v32 = vmul.f32 1.442695, %v522_v27  ;;  %v486_v33 = vadd.f32 %v1578_v50, %v485_v30 }
 0x213   :  { %v1252_v34 = vpop.eup %1251  ;;  %1265 = vpow2.f32 %v548_v26  ;;  %v525_v35 = vsub.f32 0.0, %v491_v29  ;;  %v1084_v36 = vpop.f32.mrf.mxu1 }
 0x214   :  { %1267 = vrcp.f32 %v562_v31  ;;  %v565_v37 = vadd.f32 1.0, %v1252_v34  ;;  %v524_v38 = vsub.f32 0.0, %v486_v33  ;;  %v501_v39 = vadd.f32 %v1084_v36, %v1578_v50  ;;  %v1599_v34 = vld [vmem:[%s1629_s6] ss:$0 sm:$0xff]  ;;  %s1489_s6 = smov [#allocation10]  }
 0x215   :  { %v1254_v40 = vpop.eup %1253  ;;  %1269 = vpow2.f32 %v546_v32  ;;  %v552_v41 = vmul.f32 1.442695, %v525_v35  ;;  %v495_v42 = vpop.f32.mrf.mxu1  ;;  %s863_s23 = sshll.u32 %s1489_s6, 4  ;;  %s864_s23 = int_to_ptr.vmem [resolvable:$true] %s863_s23 }
 0x216   :  { %1271 = vrcp.f32 %v565_v37  ;;  %v564_v43 = vadd.f32 1.0, %v1254_v40  ;;  %v550_v44 = vmul.f32 1.442695, %v524_v38  ;;  %v527_v45 = vsub.f32 0.0, %v501_v39  ;;  %s1455_s24 = scalar_lea.vmem %s864_s23, 2048  ;;  %p1460_p7 = scmp.lt.s32.totalorder %s864_s23, %s864_s23 }
 0x217   :  { %v1256_v46 = vpop.eup %1255  ;;  %1273 = vpow2.f32 %v552_v41  ;;  %v496_v47 = vadd.f32 %v1578_v50, %v495_v42  ;;  %v1087_v49 = vpop.f32.mrf.mxu1  ;;  %p1456_p6 = scmp.ne.s32.totalorder %s864_s23, %s1455_s24  ;;  %p1461_p8 = scmp.lt.s32.totalorder %s1455_s24, %s1455_s24 }
 0x218   :  { %1275 = vrcp.f32 %v564_v43  ;;  %v567_v51 = vadd.f32 1.0, %v1256_v46  ;;  %v556_v52 = vmul.f32 1.442695, %v527_v45  ;;  %v511_v53 = vadd.f32 %v1087_v49, %v1578_v50 }
 0x219   :  { %v1258_v54 = vpop.eup %1257  ;;  %1277 = vpow2.f32 %v550_v44  ;;  %v526_v55 = vsub.f32 0.0, %v496_v47  ;;  %v505_v56 = vpop.f32.mrf.mxu1  ;;  %p1462_p9 = por %p1461_p8, %p1460_p7 }
 0x21a   :  { %1279 = vrcp.f32 %v567_v51  ;;  %v566_v57 = vadd.f32 1.0, %v1258_v54  ;;  %v529_v58 = vsub.f32 0.0, %v511_v53  ;;  %v506_v59 = vadd.f32 %v1578_v50, %v505_v56 }
 0x21b   :  { %v1260_v60 = vpop.eup %1259  ;;  %1281 = vpow2.f32 %v556_v52  ;;  %v554_v61 = vmul.f32 1.442695, %v526_v55  ;;  %p1463_p10 = pnand %p1462_p9, %p1456_p6 }
 0x21c   :  { %1283 = vrcp.f32 %v566_v57  ;;  %v569_v62 = vadd.f32 1.0, %v1260_v60  ;;  %v560_v63 = vmul.f32 1.442695, %v529_v58  ;;  %v528_v0 = vsub.f32 0.0, %v506_v59 }
 0x21d   :  { %v1262_v1 = vpop.eup %1261  ;;  %1285 = vpow2.f32 %v554_v61 }
 0x21e   :  { %1287 = vrcp.f32 %v569_v62  ;;  %v568_v2 = vadd.f32 1.0, %v1262_v1  ;;  %v558_v3 = vmul.f32 1.442695, %v528_v0 }
 0x21f   :  { %v1264_v4 = vpop.eup %1263  ;;  %1289 = vpow2.f32 %v560_v63 }
 0x220   :  { %v1266_v5 = vpop.eup %1265  ;;  %1291 = vrcp.f32 %v568_v2 }
 0x221   :  { %v1268_v48 = vpop.eup %1267  ;;  %1293 = vpow2.f32 %v558_v3  ;;  %v571_v50 = vadd.f32 1.0, %v1266_v5 }
 0x222   :  { %v1270_v6 = vpop.eup %1269  ;;  %1120 = vmatprep.mubr.f32.mxu0 %v1268_v48 }
 0x223   :  { %v1272_v7 = vpop.eup %1271  ;;  %v570_v8 = vadd.f32 1.0, %v1270_v6  ;;  %1121 = vmatmul.mubr.f32.vlgmr.msra.gmra.mxu0 %v1264_v4 }
 0x224   :  { %v1274_v9 = vpop.eup %1273 }
 0x225   :  { %v1276_v10 = vpop.eup %1275  ;;  %1295 = vrcp.f32 %v570_v8  ;;  %v573_v12 = vadd.f32 1.0, %v1274_v9 }
 0x226   :  { %v1278_v11 = vpop.eup %1277  ;;  %1297 = vrcp.f32 %v571_v50  ;;  %1123 = vmatprep.mubr.f32.mxu0 %v1276_v10 }
 0x227   :  { %v1280_v13 = vpop.eup %1279  ;;  %v572_v14 = vadd.f32 1.0, %v1278_v11  ;;  %1124 = vmatmul.mubr.f32.gmra.mxu0 %v1272_v7 }
 0x228   :  { %v1282_v15 = vpop.eup %1281 }
 0x229   :  { %v1284_v16 = vpop.eup %1283  ;;  %1299 = vrcp.f32 %v572_v14  ;;  %v575_v18 = vadd.f32 1.0, %v1282_v15 }
 0x22a   :  { %v1286_v17 = vpop.eup %1285  ;;  %1301 = vrcp.f32 %v573_v12  ;;  %1126 = vmatprep.mubr.f32.mxu0 %v1284_v16 }
 0x22b   :  { %v1288_v19 = vpop.eup %1287  ;;  %v574_v20 = vadd.f32 1.0, %v1286_v17  ;;  %1127 = vmatmul.mubr.f32.gmra.mxu0 %v1280_v13 }
 0x22c   :  { %v1290_v21 = vpop.eup %1289 }
 0x22d   :  { %v1292_v22 = vpop.eup %1291  ;;  %1303 = vrcp.f32 %v574_v20  ;;  %v577_v24 = vadd.f32 1.0, %v1290_v21 }
 0x22e   :  { %v1294_v23 = vpop.eup %1293  ;;  %1305 = vrcp.f32 %v575_v18  ;;  %1129 = vmatprep.mubr.f32.mxu0 %v1292_v22 }
 0x22f   :  { %v576_v25 = vadd.f32 1.0, %v1294_v23  ;;  %1130 = vmatmul.mubr.f32.gmra.mxu0 %v1288_v19 }
 0x231   :  { %1307 = vrcp.f32 %v576_v25 }
 0x232   :  { %v1296_v26 = vpop.eup %1295  ;;  %1309 = vrcp.f32 %v577_v24 }
 0x233   :  { %v1298_v27 = vpop.eup %1297  ;;  %1132 = vmatprep.mubr.f32.mxu1 %v1296_v26 }
 0x234   :  { %1133 = vmatmul.mubr.f32.vlgmr.msra.gmra.mxu1 %v1298_v27 }
 0x236   :  { %v1300_v28 = vpop.eup %1299 }
 0x237   :  { %v1302_v29 = vpop.eup %1301  ;;  %1135 = vmatprep.mubr.f32.mxu1 %v1300_v28 }
 0x238   :  { %1136 = vmatmul.mubr.f32.gmra.mxu1 %v1302_v29 }
 0x23a   :  { %v1304_v30 = vpop.eup %1303 }
 0x23b   :  { %v1306_v31 = vpop.eup %1305  ;;  %1138 = vmatprep.mubr.f32.mxu1 %v1304_v30 }
 0x23c   :  { %1139 = vmatmul.mubr.f32.gmra.mxu1 %v1306_v31 }
 0x23e   :  { %v1308_v32 = vpop.eup %1307 }
 0x23f   :  { %v1310_v33 = vpop.eup %1309  ;;  %1141 = vmatprep.mubr.f32.mxu1 %v1308_v32 }
 0x240   :  { %1142 = vmatmul.mubr.f32.gmra.mxu1 %v1310_v33 }
 0x2e3   :  { %v1122_v35 = vpop.f32.mrf.mxu0 }
 0x2e4   :  { %v689_v36 = vadd.f32 %v1122_v35, %v1599_v34 }
 0x2e5   :  { %v683_v37 = vpop.f32.mrf.mxu0 }
 0x2e6   :  { %v763_v38 = vsub.f32 0.0, %v689_v36  ;;  %v684_v39 = vadd.f32 %v1599_v34, %v683_v37 }
 0x2e7   :  { %v1125_v40 = vpop.f32.mrf.mxu0 }
 0x2e8   :  { %v780_v41 = vmul.f32 1.442695, %v763_v38  ;;  %v762_v42 = vsub.f32 0.0, %v684_v39  ;;  %v699_v43 = vadd.f32 %v1125_v40, %v1599_v34 }
 0x2e9   :  { %v693_v44 = vpop.f32.mrf.mxu0 }
 0x2ea   :  { %1311 = vpow2.f32 %v780_v41  ;;  %v778_v45 = vmul.f32 1.442695, %v762_v42  ;;  %v765_v46 = vsub.f32 0.0, %v699_v43  ;;  %v694_v47 = vadd.f32 %v1599_v34, %v693_v44 }
 0x2eb   :  { %v1128_v49 = vpop.f32.mrf.mxu0 }
 0x2ec   :  { %1313 = vpow2.f32 %v778_v45  ;;  %v784_v51 = vmul.f32 1.442695, %v765_v46  ;;  %v764_v52 = vsub.f32 0.0, %v694_v47  ;;  %v709_v53 = vadd.f32 %v1128_v49, %v1599_v34 }
 0x2ed   :  { %v703_v54 = vpop.f32.mrf.mxu0 }
 0x2ee   :  { %1315 = vpow2.f32 %v784_v51  ;;  %v782_v55 = vmul.f32 1.442695, %v764_v52  ;;  %v767_v56 = vsub.f32 0.0, %v709_v53  ;;  %v704_v57 = vadd.f32 %v1599_v34, %v703_v54 }
 0x2ef   :  { %v1131_v58 = vpop.f32.mrf.mxu0 }
 0x2f0   :  { %1317 = vpow2.f32 %v782_v55  ;;  %v788_v59 = vmul.f32 1.442695, %v767_v56  ;;  %v766_v60 = vsub.f32 0.0, %v704_v57  ;;  %v719_v61 = vadd.f32 %v1131_v58, %v1599_v34 }
 0x2f1   :  { %v713_v62 = vpop.f32.mrf.mxu0 }
 0x2f2   :  { %1319 = vpow2.f32 %v788_v59  ;;  %v786_v63 = vmul.f32 1.442695, %v766_v60  ;;  %v769_v0 = vsub.f32 0.0, %v719_v61  ;;  %v714_v1 = vadd.f32 %v1599_v34, %v713_v62 }
 0x2f4   :  { %1321 = vpow2.f32 %v786_v63  ;;  %v792_v2 = vmul.f32 1.442695, %v769_v0  ;;  %v768_v3 = vsub.f32 0.0, %v714_v1  ;;  %v1134_v4 = vpop.f32.mrf.mxu1 }
 0x2f5   :  { %v729_v5 = vadd.f32 %v1134_v4, %v1599_v34 }
 0x2f6   :  { %1323 = vpow2.f32 %v792_v2  ;;  %v790_v48 = vmul.f32 1.442695, %v768_v3  ;;  %v723_v6 = vpop.f32.mrf.mxu1 }
 0x2f7   :  { %v1312_v50 = vpop.eup %1311  ;;  %v771_v7 = vsub.f32 0.0, %v729_v5  ;;  %v724_v8 = vadd.f32 %v1599_v34, %v723_v6 }
 0x2f8   :  { %v811_v9 = vadd.f32 1.0, %v1312_v50  ;;  %1325 = vpow2.f32 %v790_v48  ;;  %v1137_v10 = vpop.f32.mrf.mxu1 }
 0x2f9   :  { %v1314_v11 = vpop.eup %1313  ;;  %v796_v12 = vmul.f32 1.442695, %v771_v7  ;;  %v770_v13 = vsub.f32 0.0, %v724_v8  ;;  %v739_v14 = vadd.f32 %v1137_v10, %v1599_v34 }
 0x2fa   :  { %1327 = vrcp.f32 %v811_v9  ;;  %v810_v15 = vadd.f32 1.0, %v1314_v11  ;;  %v733_v16 = vpop.f32.mrf.mxu1 }
 0x2fb   :  { %v1316_v17 = vpop.eup %1315  ;;  %1329 = vpow2.f32 %v796_v12  ;;  %v794_v18 = vmul.f32 1.442695, %v770_v13  ;;  %v773_v19 = vsub.f32 0.0, %v739_v14  ;;  %v734_v20 = vadd.f32 %v1599_v34, %v733_v16 }
 0x2fc   :  { %1331 = vrcp.f32 %v810_v15  ;;  %v813_v21 = vadd.f32 1.0, %v1316_v17  ;;  %v1140_v22 = vpop.f32.mrf.mxu1 }
 0x2fd   :  { %v1318_v23 = vpop.eup %1317  ;;  %1333 = vpow2.f32 %v794_v18  ;;  %v800_v24 = vmul.f32 1.442695, %v773_v19  ;;  %v772_v25 = vsub.f32 0.0, %v734_v20  ;;  %v749_v26 = vadd.f32 %v1140_v22, %v1599_v34 }
 0x2fe   :  { %1335 = vrcp.f32 %v813_v21  ;;  %v812_v27 = vadd.f32 1.0, %v1318_v23  ;;  %v743_v28 = vpop.f32.mrf.mxu1 }
 0x2ff   :  { %v1320_v29 = vpop.eup %1319  ;;  %1337 = vpow2.f32 %v800_v24  ;;  %v798_v30 = vmul.f32 1.442695, %v772_v25  ;;  %v775_v31 = vsub.f32 0.0, %v749_v26  ;;  %v744_v32 = vadd.f32 %v1599_v34, %v743_v28 }
 0x300   :  { %1339 = vrcp.f32 %v812_v27  ;;  %v815_v33 = vadd.f32 1.0, %v1320_v29  ;;  %v1143_v35 = vpop.f32.mrf.mxu1 }
 0x301   :  { %v1322_v36 = vpop.eup %1321  ;;  %1341 = vpow2.f32 %v798_v30  ;;  %v804_v37 = vmul.f32 1.442695, %v775_v31  ;;  %v774_v38 = vsub.f32 0.0, %v744_v32  ;;  %v759_v39 = vadd.f32 %v1143_v35, %v1599_v34 }
 0x302   :  { %1343 = vrcp.f32 %v815_v33  ;;  %v814_v40 = vadd.f32 1.0, %v1322_v36  ;;  %v753_v41 = vpop.f32.mrf.mxu1 }
 0x303   :  { %v1324_v42 = vpop.eup %1323  ;;  %1345 = vpow2.f32 %v804_v37  ;;  %v802_v43 = vmul.f32 1.442695, %v774_v38  ;;  %v777_v44 = vsub.f32 0.0, %v759_v39  ;;  %v754_v45 = vadd.f32 %v1599_v34, %v753_v41 }
 0x304   :  { %1347 = vrcp.f32 %v814_v40  ;;  %v817_v46 = vadd.f32 1.0, %v1324_v42 }
 0x305   :  { %v1326_v47 = vpop.eup %1325  ;;  %1349 = vpow2.f32 %v802_v43  ;;  %v808_v49 = vmul.f32 1.442695, %v777_v44  ;;  %v776_v51 = vsub.f32 0.0, %v754_v45 }
 0x306   :  { %1351 = vrcp.f32 %v817_v46  ;;  %v816_v52 = vadd.f32 1.0, %v1326_v47 }
 0x307   :  { %v1328_v53 = vpop.eup %1327  ;;  %1353 = vpow2.f32 %v808_v49  ;;  %v806_v54 = vmul.f32 1.442695, %v776_v51 }
 0x308   :  { %v1330_v55 = vpop.eup %1329  ;;  %843 = vst [vmem:[#allocation10 + $0x8] sm:$0xff] %v1328_v53  ;;  %1355 = vrcp.f32 %v816_v52 }
 0x309   :  { %v1332_v56 = vpop.eup %1331  ;;  %v819_v57 = vadd.f32 1.0, %v1330_v55  ;;  %1357 = vpow2.f32 %v806_v54 }
 0x30a   :  { %v1334_v58 = vpop.eup %1333  ;;  %842 = vst [vmem:[#allocation10] sm:$0xff] %v1332_v56 }
 0x30b   :  { %v1336_v34 = vpop.eup %1335  ;;  %1359 = vrcp.f32 %v819_v57  ;;  %v818_v59 = vadd.f32 1.0, %v1334_v58 }
 0x30c   :  { %v1338_v60 = vpop.eup %1337  ;;  %845 = vst [vmem:[#allocation10 + $0x18] sm:$0xff] %v1336_v34 }
 0x30d   :  { %v1340_v61 = vpop.eup %1339  ;;  %1361 = vrcp.f32 %v818_v59  ;;  %v821_v62 = vadd.f32 1.0, %v1338_v60 }
 0x30e   :  { %v1342_v63 = vpop.eup %1341  ;;  %844 = vst [vmem:[#allocation10 + $0x10] sm:$0xff] %v1340_v61 }
 0x30f   :  { %v1344_v0 = vpop.eup %1343  ;;  %1363 = vrcp.f32 %v821_v62  ;;  %v820_v1 = vadd.f32 1.0, %v1342_v63 }
 0x310   :  { %v1346_v2 = vpop.eup %1345  ;;  %847 = vst [vmem:[#allocation10 + $0x28] sm:$0xff] %v1344_v0 }
 0x311   :  { %v1348_v3 = vpop.eup %1347  ;;  %1365 = vrcp.f32 %v820_v1  ;;  %v823_v4 = vadd.f32 1.0, %v1346_v2 }
 0x312   :  { %v1350_v5 = vpop.eup %1349  ;;  %846 = vst [vmem:[#allocation10 + $0x20] sm:$0xff] %v1348_v3 }
 0x313   :  { %v1352_v48 = vpop.eup %1351  ;;  %1367 = vrcp.f32 %v823_v4  ;;  %v822_v6 = vadd.f32 1.0, %v1350_v5 }
 0x314   :  { %v1354_v50 = vpop.eup %1353  ;;  %849 = vst [vmem:[#allocation10 + $0x38] sm:$0xff] %v1352_v48 }
 0x315   :  { %v1356_v7 = vpop.eup %1355  ;;  %1369 = vrcp.f32 %v822_v6  ;;  %v825_v8 = vadd.f32 1.0, %v1354_v50 }
 0x316   :  { %v1358_v9 = vpop.eup %1357  ;;  %848 = vst [vmem:[#allocation10 + $0x30] sm:$0xff] %v1356_v7 }
 0x317   :  { %1371 = vrcp.f32 %v825_v8  ;;  %v824_v10 = vadd.f32 1.0, %v1358_v9 }
 0x318   :  { %v1360_v11 = vpop.eup %1359 }
 0x319   :  { %851 = vst [vmem:[#allocation10 + $0x48] sm:$0xff] %v1360_v11  ;;  %1373 = vrcp.f32 %v824_v10 }
 0x31a   :  { %v1362_v12 = vpop.eup %1361 }
 0x31b   :  { %850 = vst [vmem:[#allocation10 + $0x40] sm:$0xff] %v1362_v12 }
 0x31c   :  { %v1364_v13 = vpop.eup %1363 }
 0x31d   :  { %853 = vst [vmem:[#allocation10 + $0x58] sm:$0xff] %v1364_v13 }
 0x31e   :  { %v1366_v14 = vpop.eup %1365 }
 0x31f   :  { %852 = vst [vmem:[#allocation10 + $0x50] sm:$0xff] %v1366_v14 }
 0x320   :  { %v1368_v15 = vpop.eup %1367 }
 0x321   :  { %855 = vst [vmem:[#allocation10 + $0x68] sm:$0xff] %v1368_v15 }
 0x322   :  { %v1370_v16 = vpop.eup %1369 }
 0x323   :  { %854 = vst [vmem:[#allocation10 + $0x60] sm:$0xff] %v1370_v16 }
 0x324   :  { %v1372_v17 = vpop.eup %1371 }
 0x325   :  { %857 = vst [vmem:[#allocation10 + $0x78] sm:$0xff] %v1372_v17 }
 0x326   :  { %v1374_v18 = vpop.eup %1373 }
 0x327   :  { %856 = vst [vmem:[#allocation10 + $0x70] sm:$0xff] %v1374_v18 }
 0x328   :  { %1466 = shalt.err (!%p1463_p10)
}
 0x329   :  { %869 = dma.vmem_to_hbm [thread:$0]  %s864_s23, 2048, %s1630_s7, [#allocation4], %s1485_s29, %s1485_s29, %s1486_s30  }
 0x32a   :  { %1481 = dma.done.wait [#allocation4], 2048  }
 0x32b   :  { %1482 = vsyncadd [#allocation4], 4294965248 }
 0x32c   :  { %873 = vsyncpa [#allocation3], 1 }
 0x32d   :  { %874 = vsyncpa [#allocation6], 1 }
 0x32e   :  { %875 = vsyncpa [#allocation9], 1 }
 0x32f   :  { %876 = vsyncpa [#allocation4], 1 }

</bundles_post_ra>
